<compile_context>
chip_gen: v7x
topology: tpu7x:2x2x1
jax: 0.10.0
libtpu: 0.0.40
codegen_flags: <defaults>
</compile_context>

<pallas_src>
import functools

import jax
import jax.numpy as jnp
from jax.experimental import pallas as pl
from jax.experimental.pallas import tpu as pltpu


def _round_up(n, m):
    return ((n + m - 1) // m) * m


def _cdiv(a, b):
    return (a + b - 1) // b


def _event_decoder_kernel(*refs, n_hidden_layers, dot_dtype):
    if n_hidden_layers > 0:
        x_ref, w0_ref, b0_ref, wh_ref, bh_ref, w2_ref, b2_ref, o_ref = refs
    else:
        x_ref, w0_ref, b0_ref, w2_ref, b2_ref, o_ref = refs
        wh_ref = bh_ref = None

    # Input layer: Linear + ReLU. Dots run with dot_dtype operands on the MXU and
    # accumulate in f32; bias add / ReLU stay in f32 on the VPU.
    h = jnp.dot(x_ref[...].astype(dot_dtype), w0_ref[...],
                preferred_element_type=jnp.float32)
    h = jnp.maximum(h + b0_ref[...], 0.0)

    # Hidden hid->hid layers (num_hidden - 1 of them), statically unrolled.
    for l in range(n_hidden_layers):
        h = jnp.dot(h.astype(dot_dtype), wh_ref[l],
                    preferred_element_type=jnp.float32)
        h = jnp.maximum(h + bh_ref[l], 0.0)

    # Output layer (no activation); natural (unpadded) output width.
    out = jnp.dot(h.astype(dot_dtype), w2_ref[...],
                  preferred_element_type=jnp.float32) + b2_ref[...]
    o_ref[...] = out.astype(o_ref.dtype)


def event_decoder_forward(x, params, *, tile_m=4096, min_split_batch=512):
    """EventDecoder forward pass with a single fused Pallas TPU kernel.

    x:      [B, input_size] float32.
    params: output of prepare_event_decoder_params (hidden dim pre-padded to a
            multiple of 128, weights in the matmul operand dtype, biases f32).
    """
    B, in_size = x.shape
    w0, b0 = params["w0"], params["b0"]
    wh, bh = params["wh"], params["bh"]
    w2, b2 = params["w2"], params["b2"]

    assert in_size == w0.shape[0], "input feature size mismatch"
    hid_p = w0.shape[1]
    out_size = w2.shape[1]
    L = wh.shape[0]                       # number of hid->hid layers (num_hidden - 1)
    dot_dtype = w0.dtype

    # ---- Batch tiling ----
    # Small batches: one full-extent block (legal for any B, no padding, no copies).
    # Larger batches: an even number of balanced, 8-aligned row tiles so v7x's two
    # TensorCores split the grid evenly; the last block may be partial (rows are
    # independent, so garbage rows are simply never written back).
    if B < min_split_batch:
        tile = B
        n_steps = 1
    else:
        n_steps = max(2, 2 * _cdiv(B, 2 * tile_m))
        tile = _round_up(_cdiv(B, n_steps), 8)
        n_steps = _cdiv(B, tile)

    def resident(a):
        # Constant index_map: DMA'd once, stays resident across grid steps.
        zeros = (0,) * a.ndim
        return pl.BlockSpec(a.shape, lambda i: zeros)

    in_specs = [pl.BlockSpec((tile, in_size), lambda i: (i, 0)),
                resident(w0), resident(b0)]
    args = [x, w0, b0]
    if L > 0:
        in_specs += [resident(wh), resident(bh)]
        args += [wh, bh]
    in_specs += [resident(w2), resident(b2)]
    args += [w2, b2]

    flops = 2 * B * (in_size * hid_p + L * hid_p * hid_p + hid_p * out_size)
    bytes_accessed = int(
        x.size * x.dtype.itemsize
        + B * out_size * x.dtype.itemsize
        + sum(a.size * a.dtype.itemsize for a in (w0, b0, wh, bh, w2, b2))
    )

    kernel = functools.partial(
        _event_decoder_kernel, n_hidden_layers=L, dot_dtype=dot_dtype)

    return pl.pallas_call(
        kernel,
        out_shape=jax.ShapeDtypeStruct((B, out_size), x.dtype),
        grid_spec=pltpu.PrefetchScalarGridSpec(
            num_scalar_prefetch=0,
            grid=(n_steps,),
            in_specs=in_specs,
            out_specs=pl.BlockSpec((tile, out_size), lambda i: (i, 0)),
        ),
        compiler_params=pltpu.CompilerParams(
            dimension_semantics=("parallel",),
        ),
        cost_estimate=pl.CostEstimate(
            flops=int(flops), transcendentals=0, bytes_accessed=bytes_accessed),
    )(*args)


def init_event_decoder_params(key, input_size, output_size, num_hidden=2,
                              hidden_size=10):
    """Raw f32 params mimicking torch.nn.Linear init (uniform(+-1/sqrt(fan_in))).
    Weights are stored [fan_in, fan_out], so forward is x @ W + b (== x @ W.T + b
    with PyTorch's layout)."""
    n_lin = 1 + (num_hidden - 1) + 1
    ks = jax.random.split(key, 2 * n_lin)

    def linear(kw, kb, fan_in, fan_out):
        bound = 1.0 / float(fan_in) ** 0.5
        w = jax.random.uniform(kw, (fan_in, fan_out), jnp.float32, -bound, bound)
        b = jax.random.uniform(kb, (fan_out,), jnp.float32, -bound, bound)
        return w, b

    w0, b0 = linear(ks[0], ks[1], input_size, hidden_size)
    whs, bhs = [], []
    for i in range(num_hidden - 1):
        w, b = linear(ks[2 + 2 * i], ks[3 + 2 * i], hidden_size, hidden_size)
        whs.append(w)
        bhs.append(b)
    w2, b2 = linear(ks[-2], ks[-1], hidden_size, output_size)
    return {"w0": w0, "b0": b0, "wh": whs, "bh": bhs, "w2": w2, "b2": b2}


def prepare_event_decoder_params(raw, dot_dtype=jnp.bfloat16):
    """One-time parameter prep (do NOT call per forward pass).

    Pads the hidden dim to a multiple of 128 (zero padding is exact: padded hidden
    units evaluate to relu(0 + 0) = 0 and padded weight rows contribute nothing),
    stacks the hid->hid layers, and casts matmul operands to dot_dtype (biases stay
    f32 so the accumulate / bias / ReLU path is f32)."""
    in_size, hid = raw["w0"].shape
    out_size = raw["w2"].shape[1]
    hid_p = _round_up(hid, 128)
    L = len(raw["wh"])

    def padded(a, shape):
        return jnp.pad(a, [(0, s - d) for s, d in zip(shape, a.shape)])

    w0 = padded(raw["w0"], (in_size, hid_p)).astype(dot_dtype)
    b0 = padded(raw["b0"].reshape(1, hid), (1, hid_p)).astype(jnp.float32)
    if L > 0:
        wh = jnp.stack([padded(w, (hid_p, hid_p)) for w in raw["wh"]]).astype(dot_dtype)
        bh = jnp.stack([padded(b.reshape(1, hid), (1, hid_p))
                        for b in raw["bh"]]).astype(jnp.float32)
    else:
        wh = jnp.zeros((0, hid_p, hid_p), dot_dtype)
        bh = jnp.zeros((0, 1, hid_p), jnp.float32)
    w2 = padded(raw["w2"], (hid_p, out_size)).astype(dot_dtype)
    b2 = raw["b2"].reshape(1, out_size).astype(jnp.float32)
    return {"w0": w0, "b0": b0, "wh": wh, "bh": bh, "w2": w2, "b2": b2}


def event_decoder_reference(x, raw):
    h = jax.nn.relu(x @ raw["w0"] + raw["b0"])
    for w, b in zip(raw["wh"], raw["bh"]):
        h = jax.nn.relu(h @ w + b)
    return h @ raw["w2"] + raw["b2"]


if __name__ == "__main__":
    # Shapes consistent with the module defaults (num_hidden=2, hidden_size=10).
    input_size, output_size, hidden_size, num_hidden = 32, 5, 10, 2

    key = jax.random.PRNGKey(0)
    k_p, k_x1, k_x2 = jax.random.split(key, 3)
    raw = init_event_decoder_params(k_p, input_size, output_size, num_hidden,
                                    hidden_size)

    # 1) Tiny batch, f32 matmul operands -> single full-extent block; tight tolerance.
    params_f32 = prepare_event_decoder_params(raw, dot_dtype=jnp.float32)
    x_small = jax.random.normal(k_x1, (6, input_size), jnp.float32)
    out_small = jax.block_until_ready(event_decoder_forward(x_small, params_f32))
    ref_small = event_decoder_reference(x_small, raw)
    assert out_small.shape == (6, output_size)
    assert jnp.allclose(out_small, ref_small, atol=1e-5, rtol=1e-5), "tiny-batch mismatch"

    # 2) Larger batch, bf16 matmul operands (default prep) -> even 2-step grid with a
    #    partial last block; compare against the f32 reference at bf16 tolerance.
    params_bf16 = prepare_event_decoder_params(raw)   # bf16 operands, f32 accumulate
    x_big = jax.random.normal(k_x2, (600, input_size), jnp.float32)
    out_big = jax.block_until_ready(
        event_decoder_forward(x_big, params_bf16, tile_m=4096))
    ref_big = event_decoder_reference(x_big, raw)
    assert out_big.shape == (600, output_size)
    assert jnp.allclose(out_big, ref_big, atol=5e-2, rtol=5e-2), "batched mismatch"

    print("KERNEL_OK")
</pallas_src>

<mosaic_0001>
module attributes {stable_mosaic.version = 11 : i64} {
  func.func @_event_decoder_kernel(%arg0: i32, %arg1: memref<6x32xf32, #tpu.memory_space<vmem>>, %arg2: memref<32x128xf32, #tpu.memory_space<vmem>>, %arg3: memref<1x128xf32, #tpu.memory_space<vmem>>, %arg4: memref<1x128x128xf32, #tpu.memory_space<vmem>>, %arg5: memref<1x1x128xf32, #tpu.memory_space<vmem>>, %arg6: memref<128x5xf32, #tpu.memory_space<vmem>>, %arg7: memref<1x5xf32, #tpu.memory_space<vmem>>, %arg8: memref<6x5xf32, #tpu.memory_space<vmem>>) attributes {dimension_semantics = [#tpu.dimension_semantics<parallel>], iteration_bounds = array<i64: 1>, scalar_prefetch = 0 : i64, scratch_operands = 0 : i64, tpu.core_type = #tpu.core_type<tc>, window_params = [{transform_indices = @transform_0, window_bounds = array<i64: 6, 32>}, {pipeline_mode = #tpu.pipeline_mode<synchronous>, transform_indices = @transform_1, window_bounds = array<i64: 32, 128>}, {pipeline_mode = #tpu.pipeline_mode<synchronous>, transform_indices = @transform_2, window_bounds = array<i64: 1, 128>}, {pipeline_mode = #tpu.pipeline_mode<synchronous>, transform_indices = @transform_3, window_bounds = array<i64: 1, 128, 128>}, {pipeline_mode = #tpu.pipeline_mode<synchronous>, transform_indices = @transform_4, window_bounds = array<i64: 1, 1, 128>}, {pipeline_mode = #tpu.pipeline_mode<synchronous>, transform_indices = @transform_5, window_bounds = array<i64: 128, 5>}, {pipeline_mode = #tpu.pipeline_mode<synchronous>, transform_indices = @transform_6, window_bounds = array<i64: 1, 5>}, {transform_indices = @transform_7, window_bounds = array<i64: 6, 5>}]} {
    %c0 = arith.constant 0 : index
    %c0_0 = arith.constant 0 : index
    %0 = vector.load %arg1[%c0, %c0_0] : memref<6x32xf32, #tpu.memory_space<vmem>>, vector<6x32xf32>
    %c0_1 = arith.constant 0 : index
    %c0_2 = arith.constant 0 : index
    %1 = vector.load %arg2[%c0_1, %c0_2] : memref<32x128xf32, #tpu.memory_space<vmem>>, vector<32x128xf32>
    %cst = arith.constant dense<0.000000e+00> : vector<6x128xf32>
    %2 = tpu.matmul %0, %1, %cst {dimension_numbers = #tpu.dot_dimension_numbers<[1], [0], [0], [1], [0, 0, 1, 1], [], []>} : vector<6x32xf32>, vector<32x128xf32>, vector<6x128xf32> -> vector<6x128xf32>
    %c0_3 = arith.constant 0 : index
    %c0_4 = arith.constant 0 : index
    %3 = vector.load %arg3[%c0_3, %c0_4] : memref<1x128xf32, #tpu.memory_space<vmem>>, vector<1x128xf32>
    %4 = vector.broadcast %3 : vector<1x128xf32> to vector<6x128xf32>
    %5 = arith.addf %2, %4 : vector<6x128xf32>
    %cst_5 = arith.constant 0.000000e+00 : f32
    %6 = vector.broadcast %cst_5 : f32 to vector<6x128xf32>
    %7 = arith.maximumf %5, %6 : vector<6x128xf32>
    %c0_6 = arith.constant 0 : index
    %c0_7 = arith.constant 0 : index
    %c0_8 = arith.constant 0 : index
    %8 = vector.load %arg4[%c0_6, %c0_7, %c0_8] : memref<1x128x128xf32, #tpu.memory_space<vmem>>, vector<1x128x128xf32>
    %9 = vector.shape_cast %8 : vector<1x128x128xf32> to vector<128x128xf32>
    %cst_9 = arith.constant dense<0.000000e+00> : vector<6x128xf32>
    %10 = tpu.matmul %7, %9, %cst_9 {dimension_numbers = #tpu.dot_dimension_numbers<[1], [0], [0], [1], [0, 0, 1, 1], [], []>} : vector<6x128xf32>, vector<128x128xf32>, vector<6x128xf32> -> vector<6x128xf32>
    %c0_10 = arith.constant 0 : index
    %c0_11 = arith.constant 0 : index
    %c0_12 = arith.constant 0 : index
    %11 = vector.load %arg5[%c0_10, %c0_11, %c0_12] : memref<1x1x128xf32, #tpu.memory_space<vmem>>, vector<1x1x128xf32>
    %12 = vector.shape_cast %11 : vector<1x1x128xf32> to vector<1x128xf32>
    %13 = vector.broadcast %12 : vector<1x128xf32> to vector<6x128xf32>
    %14 = arith.addf %10, %13 : vector<6x128xf32>
    %cst_13 = arith.constant 0.000000e+00 : f32
    %15 = vector.broadcast %cst_13 : f32 to vector<6x128xf32>
    %16 = arith.maximumf %14, %15 : vector<6x128xf32>
    %c0_14 = arith.constant 0 : index
    %c0_15 = arith.constant 0 : index
    %17 = vector.load %arg6[%c0_14, %c0_15] : memref<128x5xf32, #tpu.memory_space<vmem>>, vector<128x5xf32>
    %cst_16 = arith.constant dense<0.000000e+00> : vector<6x5xf32>
    %18 = tpu.matmul %16, %17, %cst_16 {dimension_numbers = #tpu.dot_dimension_numbers<[1], [0], [0], [1], [0, 0, 1, 1], [], []>} : vector<6x128xf32>, vector<128x5xf32>, vector<6x5xf32> -> vector<6x5xf32>
    %c0_17 = arith.constant 0 : index
    %c0_18 = arith.constant 0 : index
    %19 = vector.load %arg7[%c0_17, %c0_18] : memref<1x5xf32, #tpu.memory_space<vmem>>, vector<1x5xf32>
    %20 = vector.broadcast %19 : vector<1x5xf32> to vector<6x5xf32>
    %21 = arith.addf %18, %20 : vector<6x5xf32>
    %c0_19 = arith.constant 0 : index
    %c0_20 = arith.constant 0 : index
    %22 = vector.load %arg8[%c0_19, %c0_20] : memref<6x5xf32, #tpu.memory_space<vmem>>, vector<6x5xf32>
    tpu.vector_store %arg8[%c0_19, %c0_20], %21 {strides = array<i32>} : memref<6x5xf32, #tpu.memory_space<vmem>>, vector<6x5xf32>,
    return
  }
  func.func @transform_0(%arg0: i32) -> (i32, i32) {
    %c0_i32 = arith.constant 0 : i32
    %c0_i32_0 = arith.constant 0 : i32
    return %arg0, %c0_i32 : i32, i32
  }
  func.func @transform_1(%arg0: i32) -> (i32, i32) {
    %c0_i32 = arith.constant 0 : i32
    %c0_i32_0 = arith.constant 0 : i32
    %c0_i32_1 = arith.constant 0 : i32
    return %c0_i32, %c0_i32_0 : i32, i32
  }
  func.func @transform_2(%arg0: i32) -> (i32, i32) {
    %c0_i32 = arith.constant 0 : i32
    %c0_i32_0 = arith.constant 0 : i32
    %c0_i32_1 = arith.constant 0 : i32
    return %c0_i32, %c0_i32_0 : i32, i32
  }
  func.func @transform_3(%arg0: i32) -> (i32, i32, i32) {
    %c0_i32 = arith.constant 0 : i32
    %c0_i32_0 = arith.constant 0 : i32
    %c0_i32_1 = arith.constant 0 : i32
    %c0_i32_2 = arith.constant 0 : i32
    return %c0_i32, %c0_i32_0, %c0_i32_1 : i32, i32, i32
  }
  func.func @transform_4(%arg0: i32) -> (i32, i32, i32) {
    %c0_i32 = arith.constant 0 : i32
    %c0_i32_0 = arith.constant 0 : i32
    %c0_i32_1 = arith.constant 0 : i32
    %c0_i32_2 = arith.constant 0 : i32
    return %c0_i32, %c0_i32_0, %c0_i32_1 : i32, i32, i32
  }
  func.func @transform_5(%arg0: i32) -> (i32, i32) {
    %c0_i32 = arith.constant 0 : i32
    %c0_i32_0 = arith.constant 0 : i32
    %c0_i32_1 = arith.constant 0 : i32
    return %c0_i32, %c0_i32_0 : i32, i32
  }
  func.func @transform_6(%arg0: i32) -> (i32, i32) {
    %c0_i32 = arith.constant 0 : i32
    %c0_i32_0 = arith.constant 0 : i32
    %c0_i32_1 = arith.constant 0 : i32
    return %c0_i32, %c0_i32_0 : i32, i32
  }
  func.func @transform_7(%arg0: i32) -> (i32, i32) {
    %c0_i32 = arith.constant 0 : i32
    %c0_i32_0 = arith.constant 0 : i32
    return %arg0, %c0_i32 : i32, i32
  }
}

</mosaic_0001>

<bundles_post_ra>
// kernel: tpu_custom_call.1
= control target key start
LH: loop header
LB: loop body
LE: loop exit
PB: predicated region body
PF: predicated region fallthrough
CT: control target
= control target key end

     0   :  { %12 = vsyncpa [#allocation3], 0  ;;  %s765_s0 = inlined_call_operand.vmem [shape: f32[6,32], index: 0, kind: input, shape index: {}]   ;;  %s766_s1 = inlined_call_operand.hbm [shape: f32[32,128], index: 1, kind: input, shape index: {}]   ;;  %s767_s2 = inlined_call_operand.vmem [shape: f32[1,128], index: 2, kind: input, shape index: {}]   ;;  %s768_s3 = inlined_call_operand.vmem [shape: f32[1,128,128], index: 3, kind: input, shape index: {}]   ;;  %s769_s4 = inlined_call_operand.vmem [shape: f32[1,1,128], index: 4, kind: input, shape index: {}]   ;;  %s770_s5 = inlined_call_operand.vmem [shape: f32[128,5], index: 5, kind: input, shape index: {}]   ;;  %s771_s6 = inlined_call_operand.vmem [shape: f32[1,5], index: 6, kind: input, shape index: {}]   ;;  %s772_s7 = inlined_call_operand.hbm [shape: f32[6,5], index: 7, kind: output, shape index: {}]  }
   0x1   :  { %13 = vsyncpa [#allocation4], 0  ;;  %s565_s24 = smov [#allocation2]   ;;  %s517_s28 = scalar_lea.hbm %s766_s1, 512 }
   0x2   :  { %s21_s25 = sshll.u32 %s565_s24, 4  ;;  %p518_p0 = scmp.ne.s32.totalorder %s766_s1, %s517_s28  ;;  %s22_s25 = int_to_ptr.vmem [resolvable:$true] %s21_s25 }
   0x3   :  { %p521_p1 = scmp.lt.u32.totalorder %s517_s28, %s766_s1 }
   0x5   :  { %p523_p2 = pnand %p521_p1, %p518_p0 }
   0x7   :  { %526 = shalt.err (!%p523_p2)
}
   0x8   :  { %s527_s10 = scalar_lea.vmem %s22_s25, 512  ;;  %p532_p4 = scmp.lt.s32.totalorder %s22_s25, %s22_s25 }
   0x9   :  { %p528_p3 = scmp.ne.s32.totalorder %s22_s25, %s527_s10  ;;  %p533_p5 = scmp.lt.s32.totalorder %s527_s10, %s527_s10 }
   0xb   :  { %p534_p6 = por %p533_p5, %p532_p4 }
   0xd   :  { %p535_p7 = pnand %p534_p6, %p528_p3 }
   0xf   :  { %538 = shalt.err (!%p535_p7)
}
  0x10   :  { %s566_s11 = smov 128   ;;  %s567_s12 = smov 8  }
  0x11   :  { %27 = dma.hbm_to_vmem [thread:$0]  %s766_s1, 512, %s22_s25, [#allocation3], %s566_s11, %s566_s11, %s567_s12  }
  0x12   :  { %561 = dma.done.wait [#allocation3], 512  }
  0x13   :  { %562 = vsyncadd [#allocation3], 4294966784  ;;  %v568_v0 = vmov 0.0|0.0   ;;  %vm569_vm0 = vmmov 0   ;;  %v570_v1 = vmov 0.0   ;;  %v42_v2 = vld [vmem:[#allocation2] sm:$0xff] }
  0x14   :  { %456 = vmatprep.subr.bf16.mxu0 %v568_v0  ;;  %383 = vmatprep.mubr.msk.f32.mxu0 %vm569_vm0, %v570_v1  ;;  %v43_v3 = vld [vmem:[#allocation2 + $0x8] sm:$0xff]  ;;  %v44_v4 = vld [vmem:[#allocation2 + $0x10] sm:$0xff]  ;;  %v45_v6 = vld [vmem:[#allocation2 + $0x18] sm:$0xff]  ;;  %vm53_vm1 = vcmask 261120   ;;  %s571_s9 = smov [#allocation5]   ;;  %vm315_vm2 = vcmask 37888  }
  0x15   :  { %462 = vmatprep.subr.bf16.mxu1 %v568_v0  ;;  %418 = vmatprep.mubr.msk.f32.mxu1 %vm569_vm0, %v570_v1  ;;  %v457_v5 = vpack.c.bf16 %v43_v3, %v42_v2  ;;  %v128_v7 = vld [vmem:[%s768_s3] sm:$0xff]  ;;  %v129_v8 = vld [vmem:[%s768_s3 + $0x8] sm:$0xff]  ;;  %v130_v9 = vld [vmem:[%s768_s3 + $0x10] sm:$0xff]  ;;  %v460_v11 = vpack.c.bf16 %v45_v6, %v44_v4  ;;  %s323_s10 = sshll.u32 %s571_s9, 4  ;;  %s324_s10 = int_to_ptr.vmem [resolvable:$true] %s323_s10 }
  0x16   :  { %v131_v10 = vld [vmem:[%s768_s3 + $0x18] sm:$0xff]  ;;  %v463_v12 = vpack.c.bf16 %v129_v8, %v128_v7  ;;  %v132_v14 = vld [vmem:[%s768_s3 + $0x20] sm:$0xff]  ;;  %v133_v15 = vld [vmem:[%s768_s3 + $0x28] sm:$0xff]  ;;  %p544_p9 = scmp.lt.s32.totalorder %s324_s10, %s324_s10 }
  0x17   :  { %458 = vmatpush3.bf16.msra.mxu0 %v457_v5  ;;  %v466_v13 = vpack.c.bf16 %v131_v10, %v130_v9  ;;  %v41_v16 = vld [vmem:[%s765_s0] sm:$0x3f]  ;;  %v469_v17 = vpack.c.bf16 %v133_v15, %v132_v14  ;;  %v134_v18 = vld [vmem:[%s768_s3 + $0x30] sm:$0xff]  ;;  %v135_v19 = vld [vmem:[%s768_s3 + $0x38] sm:$0xff] }
  0x18   :  { %459 = vmatprep.subr.bf16.mxu0 %v568_v0  ;;  %464 = vmatpush3.bf16.msra.mxu1 %v463_v12  ;;  %v472_v20 = vpack.c.bf16 %v135_v19, %v134_v18  ;;  %v136_v21 = vld [vmem:[%s768_s3 + $0x40] sm:$0xff]  ;;  %v137_v22 = vld [vmem:[%s768_s3 + $0x48] sm:$0xff]  ;;  %v138_v24 = vld [vmem:[%s768_s3 + $0x50] sm:$0xff] }
  0x19   :  { %465 = vmatprep.subr.bf16.mxu1 %v568_v0  ;;  %v475_v23 = vpack.c.bf16 %v137_v22, %v136_v21  ;;  %v139_v25 = vld [vmem:[%s768_s3 + $0x58] sm:$0xff]  ;;  %v140_v27 = vld [vmem:[%s768_s3 + $0x60] sm:$0xff]  ;;  %v141_v28 = vld [vmem:[%s768_s3 + $0x68] sm:$0xff] }
  0x1a   :  { %v478_v26 = vpack.c.bf16 %v139_v25, %v138_v24  ;;  %v481_v29 = vpack.c.bf16 %v141_v28, %v140_v27  ;;  %v142_v30 = vld [vmem:[%s768_s3 + $0x70] sm:$0xff]  ;;  %v143_v31 = vld [vmem:[%s768_s3 + $0x78] sm:$0xff]  ;;  %v222_v33 = vld [vmem:[%s770_s5] sm:$0xff] }
  0x1b   :  { %461 = vmatpush3.bf16.msra.mxu0 %v460_v11  ;;  %v484_v32 = vpack.c.bf16 %v143_v31, %v142_v30  ;;  %v223_v34 = vld [vmem:[%s770_s5 + $0x8] sm:$0xff]  ;;  %v224_v35 = vld [vmem:[%s770_s5 + $0x10] sm:$0xff]  ;;  %v225_v37 = vld [vmem:[%s770_s5 + $0x18] sm:$0xff] }
  0x1c   :  { %486 = vmatprep.subr.bf16.mxu0 %v568_v0  ;;  %467 = vmatpush3.bf16.msra.mxu1 %v466_v13  ;;  %v487_v36 = vpack.c.bf16 %v223_v34, %v222_v33  ;;  %v490_v38 = vpack.c.bf16 %v225_v37, %v224_v35  ;;  %v226_v39 = vld [vmem:[%s770_s5 + $0x20] sm:$0xff]  ;;  %v227_v40 = vld [vmem:[%s770_s5 + $0x28] sm:$0xff]  ;;  %v228_v42 = vld [vmem:[%s770_s5 + $0x30] sm:$0xff] }
  0x1d   :  { %468 = vmatprep.subr.bf16.mxu1 %v568_v0  ;;  %v493_v41 = vpack.c.bf16 %v227_v40, %v226_v39  ;;  %v229_v43 = vld [vmem:[%s770_s5 + $0x38] sm:$0xff]  ;;  %v230_v45 = vld [vmem:[%s770_s5 + $0x40] sm:$0xff]  ;;  %v231_v46 = vld [vmem:[%s770_s5 + $0x48] sm:$0xff] }
  0x1e   :  { %384 = vmatmul.mubr.msk.f32.vlgmr.msra.gmra.mrb[0].mxu0 %vm53_vm1, %v41_v16  ;;  %v496_v44 = vpack.c.bf16 %v229_v43, %v228_v42  ;;  %v499_v47 = vpack.c.bf16 %v231_v46, %v230_v45  ;;  %v232_v48 = vld [vmem:[%s770_s5 + $0x50] sm:$0xff]  ;;  %v233_v49 = vld [vmem:[%s770_s5 + $0x58] sm:$0xff]  ;;  %v234_v51 = vld [vmem:[%s770_s5 + $0x60] sm:$0xff] }
  0x1f   :  { %453 = vmatprep.mubr.msk.f32.mxu0 %vm569_vm0, %v570_v1  ;;  %488 = vmatpush3.bf16.msra.mxu0 %v487_v36  ;;  %v502_v50 = vpack.c.bf16 %v233_v49, %v232_v48  ;;  %v235_v52 = vld [vmem:[%s770_s5 + $0x68] sm:$0xff]  ;;  %v332_v54 = vld [vmem:[%s767_s2] ss:$0 sm:$0xff]  ;;  %v236_v59 = vld [vmem:[%s770_s5 + $0x70] sm:$0xff] }
  0x20   :  { %470 = vmatpush3.bf16.msra.mxu1 %v469_v17  ;;  %489 = vmatprep.subr.bf16.mxu0 %v568_v0  ;;  %v505_v53 = vpack.c.bf16 %v235_v52, %v234_v51  ;;  %v237_v60 = vld [vmem:[%s770_s5 + $0x78] sm:$0xff]  ;;  %v334_v62 = vld [vmem:[%s769_s4] ss:$0 sm:$0xff]  ;;  %s539_s5 = scalar_lea.vmem %s324_s10, 128 }
  0x21   :  { %471 = vmatprep.subr.bf16.mxu1 %v568_v0  ;;  %v508_v61 = vpack.c.bf16 %v237_v60, %v236_v59  ;;  %v335_v3 = vld [vmem:[%s771_s6] ss:$0 sm:$0xff]  ;;  %p540_p8 = scmp.ne.s32.totalorder %s324_s10, %s539_s5  ;;  %p545_p10 = scmp.lt.s32.totalorder %s539_s5, %s539_s5 }
  0x23   :  { %491 = vmatpush3.bf16.msra.mxu0 %v490_v38  ;;  %p546_p11 = por %p545_p10, %p544_p9 }
  0x24   :  { %473 = vmatpush3.bf16.msra.mxu1 %v472_v20  ;;  %492 = vmatprep.subr.bf16.mxu0 %v568_v0 }
  0x25   :  { %474 = vmatprep.subr.bf16.mxu1 %v568_v0  ;;  %p547_p12 = pnand %p546_p11, %p540_p8 }
  0x27   :  { %494 = vmatpush3.bf16.msra.mxu0 %v493_v41 }
  0x28   :  { %476 = vmatpush3.bf16.msra.mxu1 %v475_v23  ;;  %495 = vmatprep.subr.bf16.mxu0 %v568_v0 }
  0x29   :  { %477 = vmatprep.subr.bf16.mxu1 %v568_v0 }
  0x2b   :  { %497 = vmatpush3.bf16.msra.mxu0 %v496_v44 }
  0x2c   :  { %479 = vmatpush3.bf16.msra.mxu1 %v478_v26  ;;  %498 = vmatprep.subr.bf16.mxu0 %v568_v0 }
  0x2d   :  { %480 = vmatprep.subr.bf16.mxu1 %v568_v0 }
  0x2f   :  { %500 = vmatpush3.bf16.msra.mxu0 %v499_v47 }
  0x30   :  { %482 = vmatpush3.bf16.msra.mxu1 %v481_v29  ;;  %501 = vmatprep.subr.bf16.mxu0 %v568_v0 }
  0x31   :  { %483 = vmatprep.subr.bf16.mxu1 %v568_v0 }
  0x33   :  { %503 = vmatpush3.bf16.msra.mxu0 %v502_v50 }
  0x34   :  { %485 = vmatpush3.bf16.msra.mxu1 %v484_v32  ;;  %504 = vmatprep.subr.bf16.mxu0 %v568_v0 }
  0x37   :  { %506 = vmatpush3.bf16.msra.mxu0 %v505_v53 }
  0x38   :  { %507 = vmatprep.subr.bf16.mxu0 %v568_v0 }
  0x3b   :  { %509 = vmatpush3.bf16.msra.mxu0 %v508_v61 }
  0xf1   :  { %v123_v55 = vpop.f32.mrb[0].mxu0 }
  0xf2   :  { %v124_v56 = vadd.f32 %v332_v54, %v123_v55  ;;  %v385_v57 = vpop.f32.mrb[1].mxu0 }
  0xf4   :  { %v127_v58 = vmax.f32 %v124_v56, 0.0 }
  0xf6   :  { %419 = vmatmul.mubr.f32.vlgmr.msra.gmra.mrb[0].mxu1 %v127_v58 }
 0x1c9   :  { %v217_v63 = vpop.f32.mrb[0].mxu1 }
 0x1ca   :  { %v218_v0 = vadd.f32 %v334_v62, %v217_v63  ;;  %v420_v1 = vpop.f32.mrb[1].mxu1 }
 0x1cc   :  { %v221_v2 = vmax.f32 %v218_v0, 0.0 }
 0x1ce   :  { %454 = vmatmul.mubr.f32.vlgmr.msra.gmra.mrb[2].mxu0 %v221_v2 }
 0x2a1   :  { %v311_v4 = vpop.f32.mrb[2].mxu0 }
 0x2a2   :  { %v312_v5 = vadd.f32 %v335_v3, %v311_v4  ;;  %v455_v6 = vpop.f32.mrb[3].mxu0 }
 0x2a4   :  { %316 = vst.msk [vmem:[#allocation5] sm:$0x3f] %vm315_vm2, %v312_v5 }
 0x2a5   :  { %550 = shalt.err (!%p547_p12)
}
 0x2a6   :  { %s551_s12 = scalar_lea.hbm %s772_s7, 128 }
 0x2a7   :  { %p552_p13 = scmp.ne.s32.totalorder %s772_s7, %s551_s12  ;;  %p555_p0 = scmp.lt.u32.totalorder %s551_s12, %s772_s7 }
 0x2a9   :  { %p557_p1 = pnand %p555_p0, %p552_p13 }
 0x2ab   :  { %560 = shalt.err (!%p557_p1)
}
 0x2ac   :  { %326 = dma.vmem_to_hbm [thread:$0]  %s324_s10, 128, %s772_s7, [#allocation4]  }
 0x2ad   :  { %563 = dma.done.wait [#allocation4], 128  }
 0x2ae   :  { %564 = vsyncadd [#allocation4], 4294967168 }
 0x2af   :  { %330 = vsyncpa [#allocation3], 1 }
 0x2b0   :  { %331 = vsyncpa [#allocation4], 1 }

</bundles_post_ra>
